<compile_context>
chip_gen: v7x
topology: tpu7x:2x2x1
jax: 0.10.0
libtpu: 0.0.40
codegen_flags: <defaults>
</compile_context>

<pallas_src>
import functools
import math

import jax
import jax.numpy as jnp
from jax.experimental import pallas as pl
from jax.experimental.pallas import tpu as pltpu

# Forward-pass-relevant SACActor hyper-parameters.
LOG_STD_MIN = -20.0
LOG_STD_MAX = 2.0
MAX_ACTION = 1.0
LN_EPS = 1e-5                      # torch.nn.LayerNorm default eps
_HALF_LOG_2PI = 0.5 * math.log(2.0 * math.pi)
_LOG2 = math.log(2.0)


def _round_up(x, m):
    return (x + m - 1) // m * m


def _softplus(x):
    # Numerically-stable softplus (matches F.softplus with beta=1).
    return jnp.maximum(x, 0.0) + jnp.log1p(jnp.exp(-jnp.abs(x)))


def sac_actor_kernel(*refs, n_hidden, action_dim):
    """All tiles are transposed: features on sublanes, batch tile on lanes."""
    states_ref, noise_ref = refs[0], refs[1]
    p = refs[2:2 + 4 * n_hidden + 4]            # per-layer (w,b,g,be), then actor halves
    act_ref, logp_ref = refs[-2], refs[-1]

    h = states_ref[...]                          # (state_dim, TB)

    # ---- encoder: [Linear -> LayerNorm (-> ReLU)] x n_hidden ----------------
    for i in range(n_hidden):
        w = p[4 * i][...]                        # (dim, prev)   PyTorch (out,in) layout
        b = p[4 * i + 1][...]                    # (dim, 1)
        g = p[4 * i + 2][...]                    # (dim, 1)
        be = p[4 * i + 3][...]                   # (dim, 1)
        dim = w.shape[0]
        inv_d = 1.0 / float(dim)

        z = jnp.dot(w, h, preferred_element_type=jnp.float32) + b      # (dim, TB)
        # Two-pass LayerNorm over the feature (sublane) axis == PyTorch semantics.
        mu = jnp.sum(z, axis=0, keepdims=True) * inv_d                 # (1, TB)
        d = z - mu
        var = jnp.sum(d * d, axis=0, keepdims=True) * inv_d            # (1, TB)
        h = d * jax.lax.rsqrt(var + LN_EPS) * g + be
        if i < n_hidden - 1:                     # ReLU only between hidden layers
            h = jnp.maximum(h, 0.0)

    # ---- actor head, pre-split into mu / log_std halves ---------------------
    wa_mu = p[4 * n_hidden][...]                 # (A, prev)
    b_mu = p[4 * n_hidden + 1][...]              # (A, 1)
    wa_ls = p[4 * n_hidden + 2][...]             # (A, prev)
    b_ls = p[4 * n_hidden + 3][...]              # (A, 1)

    mu = jnp.dot(wa_mu, h, preferred_element_type=jnp.float32) + b_mu          # (A, TB)
    log_std = jnp.dot(wa_ls, h, preferred_element_type=jnp.float32) + b_ls
    log_std = jnp.clip(log_std, LOG_STD_MIN, LOG_STD_MAX)
    std = jnp.exp(log_std)

    # ---- reparameterized sample: a = mu + std * eps --------------------------
    eps = noise_ref[...]                         # (A, TB)   rsample noise
    actions = mu + std * eps                     # (actions - mu)/std == eps exactly

    # Fused Normal log-prob + tanh-squash correction: ONE reduction over the
    # action (sublane) axis.
    lp_terms = (-0.5 * eps * eps - log_std - _HALF_LOG_2PI
                - 2.0 * (_LOG2 - actions - _softplus(-2.0 * actions)))
    logp_ref[...] = jnp.sum(lp_terms, axis=0, keepdims=True)           # (1, TB)
    act_ref[...] = jnp.tanh(actions) * MAX_ACTION                      # (A, TB)


def prepare_params(params, hidden_dims, action_dim):
    """Canonical params (w (in,out), vecs (1,dim)) -> kernel layout:
    weights (out,in), vectors (dim,1), actor head split into mu / log_std."""
    flat, idx = [], 0
    for _ in hidden_dims:
        w, b, g, be = params[idx:idx + 4]
        idx += 4
        flat += [w.T, b.reshape(-1, 1), g.reshape(-1, 1), be.reshape(-1, 1)]
    wa, ba = params[idx], params[idx + 1]
    flat += [wa[:, :action_dim].T, ba[:, :action_dim].reshape(-1, 1),
             wa[:, action_dim:].T, ba[:, action_dim:].reshape(-1, 1)]
    return tuple(flat)


def _choose_tile(B, block_b):
    # Lane-aligned (multiple of 128) batch tiles.  For large B make sure the
    # grid has >= 2 steps so v7x's two TensorCores both engage ("parallel").
    block_b = max(128, _round_up(block_b, 128))
    if B > 256:
        block_b = min(block_b, _round_up(pl.cdiv(B, 2), 128))
    return min(block_b, _round_up(max(B, 1), 128))


def sac_actor_forward(states, noise, params, hidden_dims, action_dim, *, block_b=2048):
    B, state_dim = states.shape
    flat = prepare_params(params, hidden_dims, action_dim)

    tb = _choose_tile(B, block_b)
    b_pad = _round_up(B, tb)
    nb = b_pad // tb

    # Transpose to (features, batch): batch on lanes -> lane-dense loads/stores.
    states_t = jnp.pad(states, ((0, b_pad - B), (0, 0))).T            # (state_dim, b_pad)
    noise_t = jnp.pad(noise, ((0, b_pad - B), (0, 0))).T              # (action_dim, b_pad)

    const = lambda i: (0, 0)                    # params: VMEM-resident across grid
    in_specs = [pl.BlockSpec((state_dim, tb), lambda i: (0, i)),
                pl.BlockSpec((action_dim, tb), lambda i: (0, i))]
    in_specs += [pl.BlockSpec(p.shape, const) for p in flat]

    kernel = functools.partial(sac_actor_kernel,
                               n_hidden=len(hidden_dims), action_dim=action_dim)
    act_t, logp_t = pl.pallas_call(
        kernel,
        out_shape=(jax.ShapeDtypeStruct((action_dim, b_pad), jnp.float32),
                   jax.ShapeDtypeStruct((1, b_pad), jnp.float32)),
        grid_spec=pltpu.PrefetchScalarGridSpec(
            num_scalar_prefetch=0,
            grid=(nb,),
            in_specs=in_specs,
            out_specs=[pl.BlockSpec((action_dim, tb), lambda i: (0, i)),
                       pl.BlockSpec((1, tb), lambda i: (0, i))],
        ),
        compiler_params=pltpu.CompilerParams(
            dimension_semantics=("parallel",)),     # megacore split on v7x
    )(states_t, noise_t, *flat)

    act = act_t[:, :B].T                         # back to (B, action_dim)
    logp = logp_t[0, :B]
    # Mirror torch's bounded_actions.squeeze(); note this drops ALL size-1 dims.
    return jnp.squeeze(act), logp


def sac_actor_ref(states, noise, params, hidden_dims, action_dim):
    """Pure-JAX reference matching the PyTorch forward pass."""
    h, idx = states, 0
    for i, dim in enumerate(hidden_dims):
        w, b, g, be = params[idx:idx + 4]
        idx += 4
        h = h @ w + b
        mu = jnp.mean(h, -1, keepdims=True)
        var = jnp.mean((h - mu) ** 2, -1, keepdims=True)
        h = (h - mu) / jnp.sqrt(var + LN_EPS) * g + be
        if i < len(hidden_dims) - 1:
            h = jnp.maximum(h, 0.0)
    wa, ba = params[idx], params[idx + 1]
    out = h @ wa + ba
    mu = out[:, :action_dim]
    log_std = jnp.clip(out[:, action_dim:], LOG_STD_MIN, LOG_STD_MAX)
    std = jnp.exp(log_std)
    actions = mu + std * noise
    log_prob = jnp.sum(-0.5 * ((actions - mu) / std) ** 2 - log_std - _HALF_LOG_2PI, -1)
    corr = jnp.sum(2.0 * (_LOG2 - actions - jax.nn.softplus(-2.0 * actions)), -1)
    return jnp.tanh(actions) * MAX_ACTION, log_prob - corr


def init_params(key, state_dim, hidden_dims, action_dim):
    """Deterministic synthetic parameters (shapes match the nn.Module)."""
    keys = jax.random.split(key, len(hidden_dims) + 1)
    params = []
    prev = state_dim
    for i, dim in enumerate(hidden_dims):
        w = jax.random.normal(keys[i], (prev, dim), jnp.float32) * (1.0 / math.sqrt(prev))
        params += [w, jnp.zeros((1, dim), jnp.float32),
                   jnp.ones((1, dim), jnp.float32), jnp.zeros((1, dim), jnp.float32)]
        prev = dim
    wa = jax.random.normal(keys[-1], (prev, action_dim * 2), jnp.float32) * (1.0 / math.sqrt(prev))
    params += [wa, jnp.zeros((1, action_dim * 2), jnp.float32)]
    return tuple(params)


if __name__ == "__main__":
    STATE_DIM, ACTION_DIM = 16, 4
    HIDDEN_DIMS = (32, 32)

    key = jax.random.PRNGKey(0)
    k_state, k_noise, k_param = jax.random.split(key, 3)
    params = init_params(k_param, STATE_DIM, HIDDEN_DIMS, ACTION_DIM)

    # --- small-batch case (module's typical single-transition call) ----------
    B = 2
    states = jax.random.normal(k_state, (B, STATE_DIM), jnp.float32)
    noise = jax.random.normal(k_noise, (B, ACTION_DIM), jnp.float32)  # rsample eps

    actions, log_probs = sac_actor_forward(states, noise, params, HIDDEN_DIMS, ACTION_DIM)
    jax.block_until_ready((actions, log_probs))
    assert actions.shape == (B, ACTION_DIM)
    assert log_probs.shape == (B,)

    ref_a, ref_lp = sac_actor_ref(states, noise, params, HIDDEN_DIMS, ACTION_DIM)
    assert jnp.allclose(actions, ref_a, atol=2e-4, rtol=2e-4)
    assert jnp.allclose(log_probs, ref_lp, atol=2e-4, rtol=2e-4)

    # --- multi-tile batch: exercises grid>1 / resident-weight / padding path --
    B2 = 300
    states2 = jax.random.normal(k_state, (B2, STATE_DIM), jnp.float32)
    noise2 = jax.random.normal(k_noise, (B2, ACTION_DIM), jnp.float32)
    a2, lp2 = sac_actor_forward(states2, noise2, params, HIDDEN_DIMS, ACTION_DIM,
                                block_b=128)   # -> 3 grid steps of tb=128
    jax.block_until_ready((a2, lp2))
    r_a2, r_lp2 = sac_actor_ref(states2, noise2, params, HIDDEN_DIMS, ACTION_DIM)
    assert a2.shape == (B2, ACTION_DIM) and lp2.shape == (B2,)
    assert jnp.allclose(a2, r_a2, atol=2e-4, rtol=2e-4)
    assert jnp.allclose(lp2, r_lp2, atol=2e-4, rtol=2e-4)

    assert bool(jnp.all(jnp.isfinite(actions))) and bool(jnp.all(jnp.isfinite(log_probs)))
    print("KERNEL_OK")
</pallas_src>

<mosaic_0001>
module attributes {stable_mosaic.version = 11 : i64} {
  func.func @sac_actor_kernel(%arg0: i32, %arg1: memref<16x128xf32, #tpu.memory_space<vmem>>, %arg2: memref<4x128xf32, #tpu.memory_space<vmem>>, %arg3: memref<32x16xf32, #tpu.memory_space<vmem>>, %arg4: memref<32x1xf32, #tpu.memory_space<vmem>>, %arg5: memref<32x1xf32, #tpu.memory_space<vmem>>, %arg6: memref<32x1xf32, #tpu.memory_space<vmem>>, %arg7: memref<32x32xf32, #tpu.memory_space<vmem>>, %arg8: memref<32x1xf32, #tpu.memory_space<vmem>>, %arg9: memref<32x1xf32, #tpu.memory_space<vmem>>, %arg10: memref<32x1xf32, #tpu.memory_space<vmem>>, %arg11: memref<4x32xf32, #tpu.memory_space<vmem>>, %arg12: memref<4x1xf32, #tpu.memory_space<vmem>>, %arg13: memref<4x32xf32, #tpu.memory_space<vmem>>, %arg14: memref<4x1xf32, #tpu.memory_space<vmem>>, %arg15: memref<4x128xf32, #tpu.memory_space<vmem>>, %arg16: memref<1x128xf32, #tpu.memory_space<vmem>>) attributes {dimension_semantics = [#tpu.dimension_semantics<parallel>], iteration_bounds = array<i64: 1>, scalar_prefetch = 0 : i64, scratch_operands = 0 : i64, tpu.core_type = #tpu.core_type<tc>, window_params = [{transform_indices = @transform_0, window_bounds = array<i64: 16, 128>}, {transform_indices = @transform_1, window_bounds = array<i64: 4, 128>}, {pipeline_mode = #tpu.pipeline_mode<synchronous>, transform_indices = @transform_2, window_bounds = array<i64: 32, 16>}, {pipeline_mode = #tpu.pipeline_mode<synchronous>, transform_indices = @transform_3, window_bounds = array<i64: 32, 1>}, {pipeline_mode = #tpu.pipeline_mode<synchronous>, transform_indices = @transform_4, window_bounds = array<i64: 32, 1>}, {pipeline_mode = #tpu.pipeline_mode<synchronous>, transform_indices = @transform_5, window_bounds = array<i64: 32, 1>}, {pipeline_mode = #tpu.pipeline_mode<synchronous>, transform_indices = @transform_6, window_bounds = array<i64: 32, 32>}, {pipeline_mode = #tpu.pipeline_mode<synchronous>, transform_indices = @transform_7, window_bounds = array<i64: 32, 1>}, {pipeline_mode = #tpu.pipeline_mode<synchronous>, transform_indices = @transform_8, window_bounds = array<i64: 32, 1>}, {pipeline_mode = #tpu.pipeline_mode<synchronous>, transform_indices = @transform_9, window_bounds = array<i64: 32, 1>}, {pipeline_mode = #tpu.pipeline_mode<synchronous>, transform_indices = @transform_10, window_bounds = array<i64: 4, 32>}, {pipeline_mode = #tpu.pipeline_mode<synchronous>, transform_indices = @transform_11, window_bounds = array<i64: 4, 1>}, {pipeline_mode = #tpu.pipeline_mode<synchronous>, transform_indices = @transform_12, window_bounds = array<i64: 4, 32>}, {pipeline_mode = #tpu.pipeline_mode<synchronous>, transform_indices = @transform_13, window_bounds = array<i64: 4, 1>}, {transform_indices = @transform_14, window_bounds = array<i64: 4, 128>}, {transform_indices = @transform_15, window_bounds = array<i64: 1, 128>}]} {
    %c0 = arith.constant 0 : index
    %c0_0 = arith.constant 0 : index
    %0 = vector.load %arg1[%c0, %c0_0] : memref<16x128xf32, #tpu.memory_space<vmem>>, vector<16x128xf32>
    %c0_1 = arith.constant 0 : index
    %c0_2 = arith.constant 0 : index
    %1 = vector.load %arg3[%c0_1, %c0_2] : memref<32x16xf32, #tpu.memory_space<vmem>>, vector<32x16xf32>
    %c0_3 = arith.constant 0 : index
    %c0_4 = arith.constant 0 : index
    %2 = vector.load %arg4[%c0_3, %c0_4] : memref<32x1xf32, #tpu.memory_space<vmem>>, vector<32x1xf32>
    %c0_5 = arith.constant 0 : index
    %c0_6 = arith.constant 0 : index
    %3 = vector.load %arg5[%c0_5, %c0_6] : memref<32x1xf32, #tpu.memory_space<vmem>>, vector<32x1xf32>
    %c0_7 = arith.constant 0 : index
    %c0_8 = arith.constant 0 : index
    %4 = vector.load %arg6[%c0_7, %c0_8] : memref<32x1xf32, #tpu.memory_space<vmem>>, vector<32x1xf32>
    %cst = arith.constant dense<0.000000e+00> : vector<32x128xf32>
    %5 = tpu.matmul %1, %0, %cst {dimension_numbers = #tpu.dot_dimension_numbers<[1], [0], [0], [1], [0, 0, 1, 1], [], []>} : vector<32x16xf32>, vector<16x128xf32>, vector<32x128xf32> -> vector<32x128xf32>
    %6 = vector.broadcast %2 : vector<32x1xf32> to vector<32x128xf32>
    %7 = arith.addf %5, %6 : vector<32x128xf32>
    %cst_9 = arith.constant dense<0.000000e+00> : vector<128xf32>
    %8 = vector.multi_reduction <add>, %7, %cst_9 [0] : vector<32x128xf32> to vector<128xf32>
    %9 = vector.shape_cast %8 : vector<128xf32> to vector<1x128xf32>
    %cst_10 = arith.constant 3.125000e-02 : f32
    %10 = vector.broadcast %cst_10 : f32 to vector<1x128xf32>
    %11 = arith.mulf %9, %10 : vector<1x128xf32>
    %12 = vector.broadcast %11 : vector<1x128xf32> to vector<32x128xf32>
    %13 = arith.subf %7, %12 : vector<32x128xf32>
    %14 = arith.mulf %13, %13 : vector<32x128xf32>
    %cst_11 = arith.constant dense<0.000000e+00> : vector<128xf32>
    %15 = vector.multi_reduction <add>, %14, %cst_11 [0] : vector<32x128xf32> to vector<128xf32>
    %16 = vector.shape_cast %15 : vector<128xf32> to vector<1x128xf32>
    %cst_12 = arith.constant 3.125000e-02 : f32
    %17 = vector.broadcast %cst_12 : f32 to vector<1x128xf32>
    %18 = arith.mulf %16, %17 : vector<1x128xf32>
    %cst_13 = arith.constant 9.99999974E-6 : f32
    %19 = vector.broadcast %cst_13 : f32 to vector<1x128xf32>
    %20 = arith.addf %18, %19 : vector<1x128xf32>
    %21 = math.rsqrt %20 : vector<1x128xf32>
    %22 = vector.broadcast %21 : vector<1x128xf32> to vector<32x128xf32>
    %23 = arith.mulf %13, %22 : vector<32x128xf32>
    %24 = vector.broadcast %3 : vector<32x1xf32> to vector<32x128xf32>
    %25 = arith.mulf %23, %24 : vector<32x128xf32>
    %26 = vector.broadcast %4 : vector<32x1xf32> to vector<32x128xf32>
    %27 = arith.addf %25, %26 : vector<32x128xf32>
    %cst_14 = arith.constant 0.000000e+00 : f32
    %28 = vector.broadcast %cst_14 : f32 to vector<32x128xf32>
    %29 = arith.maximumf %27, %28 : vector<32x128xf32>
    %c0_15 = arith.constant 0 : index
    %c0_16 = arith.constant 0 : index
    %30 = vector.load %arg7[%c0_15, %c0_16] : memref<32x32xf32, #tpu.memory_space<vmem>>, vector<32x32xf32>
    %c0_17 = arith.constant 0 : index
    %c0_18 = arith.constant 0 : index
    %31 = vector.load %arg8[%c0_17, %c0_18] : memref<32x1xf32, #tpu.memory_space<vmem>>, vector<32x1xf32>
    %c0_19 = arith.constant 0 : index
    %c0_20 = arith.constant 0 : index
    %32 = vector.load %arg9[%c0_19, %c0_20] : memref<32x1xf32, #tpu.memory_space<vmem>>, vector<32x1xf32>
    %c0_21 = arith.constant 0 : index
    %c0_22 = arith.constant 0 : index
    %33 = vector.load %arg10[%c0_21, %c0_22] : memref<32x1xf32, #tpu.memory_space<vmem>>, vector<32x1xf32>
    %cst_23 = arith.constant dense<0.000000e+00> : vector<32x128xf32>
    %34 = tpu.matmul %30, %29, %cst_23 {dimension_numbers = #tpu.dot_dimension_numbers<[1], [0], [0], [1], [0, 0, 1, 1], [], []>} : vector<32x32xf32>, vector<32x128xf32>, vector<32x128xf32> -> vector<32x128xf32>
    %35 = vector.broadcast %31 : vector<32x1xf32> to vector<32x128xf32>
    %36 = arith.addf %34, %35 : vector<32x128xf32>
    %cst_24 = arith.constant dense<0.000000e+00> : vector<128xf32>
    %37 = vector.multi_reduction <add>, %36, %cst_24 [0] : vector<32x128xf32> to vector<128xf32>
    %38 = vector.shape_cast %37 : vector<128xf32> to vector<1x128xf32>
    %cst_25 = arith.constant 3.125000e-02 : f32
    %39 = vector.broadcast %cst_25 : f32 to vector<1x128xf32>
    %40 = arith.mulf %38, %39 : vector<1x128xf32>
    %41 = vector.broadcast %40 : vector<1x128xf32> to vector<32x128xf32>
    %42 = arith.subf %36, %41 : vector<32x128xf32>
    %43 = arith.mulf %42, %42 : vector<32x128xf32>
    %cst_26 = arith.constant dense<0.000000e+00> : vector<128xf32>
    %44 = vector.multi_reduction <add>, %43, %cst_26 [0] : vector<32x128xf32> to vector<128xf32>
    %45 = vector.shape_cast %44 : vector<128xf32> to vector<1x128xf32>
    %cst_27 = arith.constant 3.125000e-02 : f32
    %46 = vector.broadcast %cst_27 : f32 to vector<1x128xf32>
    %47 = arith.mulf %45, %46 : vector<1x128xf32>
    %cst_28 = arith.constant 9.99999974E-6 : f32
    %48 = vector.broadcast %cst_28 : f32 to vector<1x128xf32>
    %49 = arith.addf %47, %48 : vector<1x128xf32>
    %50 = math.rsqrt %49 : vector<1x128xf32>
    %51 = vector.broadcast %50 : vector<1x128xf32> to vector<32x128xf32>
    %52 = arith.mulf %42, %51 : vector<32x128xf32>
    %53 = vector.broadcast %32 : vector<32x1xf32> to vector<32x128xf32>
    %54 = arith.mulf %52, %53 : vector<32x128xf32>
    %55 = vector.broadcast %33 : vector<32x1xf32> to vector<32x128xf32>
    %56 = arith.addf %54, %55 : vector<32x128xf32>
    %c0_29 = arith.constant 0 : index
    %c0_30 = arith.constant 0 : index
    %57 = vector.load %arg11[%c0_29, %c0_30] : memref<4x32xf32, #tpu.memory_space<vmem>>, vector<4x32xf32>
    %c0_31 = arith.constant 0 : index
    %c0_32 = arith.constant 0 : index
    %58 = vector.load %arg12[%c0_31, %c0_32] : memref<4x1xf32, #tpu.memory_space<vmem>>, vector<4x1xf32>
    %c0_33 = arith.constant 0 : index
    %c0_34 = arith.constant 0 : index
    %59 = vector.load %arg13[%c0_33, %c0_34] : memref<4x32xf32, #tpu.memory_space<vmem>>, vector<4x32xf32>
    %c0_35 = arith.constant 0 : index
    %c0_36 = arith.constant 0 : index
    %60 = vector.load %arg14[%c0_35, %c0_36] : memref<4x1xf32, #tpu.memory_space<vmem>>, vector<4x1xf32>
    %cst_37 = arith.constant dense<0.000000e+00> : vector<4x128xf32>
    %61 = tpu.matmul %57, %56, %cst_37 {dimension_numbers = #tpu.dot_dimension_numbers<[1], [0], [0], [1], [0, 0, 1, 1], [], []>} : vector<4x32xf32>, vector<32x128xf32>, vector<4x128xf32> -> vector<4x128xf32>
    %62 = vector.broadcast %58 : vector<4x1xf32> to vector<4x128xf32>
    %63 = arith.addf %61, %62 : vector<4x128xf32>
    %cst_38 = arith.constant dense<0.000000e+00> : vector<4x128xf32>
    %64 = tpu.matmul %59, %56, %cst_38 {dimension_numbers = #tpu.dot_dimension_numbers<[1], [0], [0], [1], [0, 0, 1, 1], [], []>} : vector<4x32xf32>, vector<32x128xf32>, vector<4x128xf32> -> vector<4x128xf32>
    %65 = vector.broadcast %60 : vector<4x1xf32> to vector<4x128xf32>
    %66 = arith.addf %64, %65 : vector<4x128xf32>
    %cst_39 = arith.constant -2.000000e+01 : f32
    %cst_40 = arith.constant 2.000000e+00 : f32
    %67 = vector.broadcast %cst_39 : f32 to vector<4x128xf32>
    %68 = arith.maximumf %67, %66 : vector<4x128xf32>
    %69 = vector.broadcast %cst_40 : f32 to vector<4x128xf32>
    %70 = arith.minimumf %69, %68 : vector<4x128xf32>
    %71 = math.exp %70 : vector<4x128xf32>
    %c0_41 = arith.constant 0 : index
    %c0_42 = arith.constant 0 : index
    %72 = vector.load %arg2[%c0_41, %c0_42] : memref<4x128xf32, #tpu.memory_space<vmem>>, vector<4x128xf32>
    %73 = arith.mulf %71, %72 : vector<4x128xf32>
    %74 = arith.addf %63, %73 : vector<4x128xf32>
    %cst_43 = arith.constant -5.000000e-01 : f32
    %75 = vector.broadcast %cst_43 : f32 to vector<4x128xf32>
    %76 = arith.mulf %75, %72 : vector<4x128xf32>
    %77 = arith.mulf %76, %72 : vector<4x128xf32>
    %78 = arith.subf %77, %70 : vector<4x128xf32>
    %cst_44 = arith.constant 0.918938517 : f32
    %79 = vector.broadcast %cst_44 : f32 to vector<4x128xf32>
    %80 = arith.subf %78, %79 : vector<4x128xf32>
    %cst_45 = arith.constant 0.693147182 : f32
    %81 = vector.broadcast %cst_45 : f32 to vector<4x128xf32>
    %82 = arith.subf %81, %74 : vector<4x128xf32>
    %cst_46 = arith.constant -2.000000e+00 : f32
    %83 = vector.broadcast %cst_46 : f32 to vector<4x128xf32>
    %84 = arith.mulf %83, %74 : vector<4x128xf32>
    %cst_47 = arith.constant 0.000000e+00 : f32
    %85 = vector.broadcast %cst_47 : f32 to vector<4x128xf32>
    %86 = arith.maximumf %84, %85 : vector<4x128xf32>
    %87 = math.absf %84 : vector<4x128xf32>
    %cst_48 = arith.constant 0.000000e+00 : f32
    %88 = vector.broadcast %cst_48 : f32 to vector<4x128xf32>
    %89 = arith.subf %88, %87 : vector<4x128xf32>
    %90 = math.exp %89 : vector<4x128xf32>
    %91 = math.log1p %90 : vector<4x128xf32>
    %92 = arith.addf %86, %91 : vector<4x128xf32>
    %93 = arith.subf %82, %92 : vector<4x128xf32>
    %cst_49 = arith.constant 2.000000e+00 : f32
    %94 = vector.broadcast %cst_49 : f32 to vector<4x128xf32>
    %95 = arith.mulf %94, %93 : vector<4x128xf32>
    %96 = arith.subf %80, %95 : vector<4x128xf32>
    %cst_50 = arith.constant dense<0.000000e+00> : vector<128xf32>
    %97 = vector.multi_reduction <add>, %96, %cst_50 [0] : vector<4x128xf32> to vector<128xf32>
    %98 = vector.shape_cast %97 : vector<128xf32> to vector<1x128xf32>
    %c0_51 = arith.constant 0 : index
    %c0_52 = arith.constant 0 : index
    %99 = vector.load %arg16[%c0_51, %c0_52] : memref<1x128xf32, #tpu.memory_space<vmem>>, vector<1x128xf32>
    tpu.vector_store %arg16[%c0_51, %c0_52], %98 {strides = array<i32>} : memref<1x128xf32, #tpu.memory_space<vmem>>, vector<1x128xf32>,
    %100 = math.tanh %74 : vector<4x128xf32>
    %cst_53 = arith.constant 1.000000e+00 : f32
    %101 = vector.broadcast %cst_53 : f32 to vector<4x128xf32>
    %102 = arith.mulf %100, %101 : vector<4x128xf32>
    %c0_54 = arith.constant 0 : index
    %c0_55 = arith.constant 0 : index
    %103 = vector.load %arg15[%c0_54, %c0_55] : memref<4x128xf32, #tpu.memory_space<vmem>>, vector<4x128xf32>
    tpu.vector_store %arg15[%c0_54, %c0_55], %102 {strides = array<i32>} : memref<4x128xf32, #tpu.memory_space<vmem>>, vector<4x128xf32>,
    return
  }
  func.func @transform_0(%arg0: i32) -> (i32, i32) {
    %c0_i32 = arith.constant 0 : i32
    %c0_i32_0 = arith.constant 0 : i32
    return %c0_i32, %arg0 : i32, i32
  }
  func.func @transform_1(%arg0: i32) -> (i32, i32) {
    %c0_i32 = arith.constant 0 : i32
    %c0_i32_0 = arith.constant 0 : i32
    return %c0_i32, %arg0 : i32, i32
  }
  func.func @transform_2(%arg0: i32) -> (i32, i32) {
    %c0_i32 = arith.constant 0 : i32
    %c0_i32_0 = arith.constant 0 : i32
    %c0_i32_1 = arith.constant 0 : i32
    return %c0_i32, %c0_i32_0 : i32, i32
  }
  func.func @transform_3(%arg0: i32) -> (i32, i32) {
    %c0_i32 = arith.constant 0 : i32
    %c0_i32_0 = arith.constant 0 : i32
    %c0_i32_1 = arith.constant 0 : i32
    return %c0_i32, %c0_i32_0 : i32, i32
  }
  func.func @transform_4(%arg0: i32) -> (i32, i32) {
    %c0_i32 = arith.constant 0 : i32
    %c0_i32_0 = arith.constant 0 : i32
    %c0_i32_1 = arith.constant 0 : i32
    return %c0_i32, %c0_i32_0 : i32, i32
  }
  func.func @transform_5(%arg0: i32) -> (i32, i32) {
    %c0_i32 = arith.constant 0 : i32
    %c0_i32_0 = arith.constant 0 : i32
    %c0_i32_1 = arith.constant 0 : i32
    return %c0_i32, %c0_i32_0 : i32, i32
  }
  func.func @transform_6(%arg0: i32) -> (i32, i32) {
    %c0_i32 = arith.constant 0 : i32
    %c0_i32_0 = arith.constant 0 : i32
    %c0_i32_1 = arith.constant 0 : i32
    return %c0_i32, %c0_i32_0 : i32, i32
  }
  func.func @transform_7(%arg0: i32) -> (i32, i32) {
    %c0_i32 = arith.constant 0 : i32
    %c0_i32_0 = arith.constant 0 : i32
    %c0_i32_1 = arith.constant 0 : i32
    return %c0_i32, %c0_i32_0 : i32, i32
  }
  func.func @transform_8(%arg0: i32) -> (i32, i32) {
    %c0_i32 = arith.constant 0 : i32
    %c0_i32_0 = arith.constant 0 : i32
    %c0_i32_1 = arith.constant 0 : i32
    return %c0_i32, %c0_i32_0 : i32, i32
  }
  func.func @transform_9(%arg0: i32) -> (i32, i32) {
    %c0_i32 = arith.constant 0 : i32
    %c0_i32_0 = arith.constant 0 : i32
    %c0_i32_1 = arith.constant 0 : i32
    return %c0_i32, %c0_i32_0 : i32, i32
  }
  func.func @transform_10(%arg0: i32) -> (i32, i32) {
    %c0_i32 = arith.constant 0 : i32
    %c0_i32_0 = arith.constant 0 : i32
    %c0_i32_1 = arith.constant 0 : i32
    return %c0_i32, %c0_i32_0 : i32, i32
  }
  func.func @transform_11(%arg0: i32) -> (i32, i32) {
    %c0_i32 = arith.constant 0 : i32
    %c0_i32_0 = arith.constant 0 : i32
    %c0_i32_1 = arith.constant 0 : i32
    return %c0_i32, %c0_i32_0 : i32, i32
  }
  func.func @transform_12(%arg0: i32) -> (i32, i32) {
    %c0_i32 = arith.constant 0 : i32
    %c0_i32_0 = arith.constant 0 : i32
    %c0_i32_1 = arith.constant 0 : i32
    return %c0_i32, %c0_i32_0 : i32, i32
  }
  func.func @transform_13(%arg0: i32) -> (i32, i32) {
    %c0_i32 = arith.constant 0 : i32
    %c0_i32_0 = arith.constant 0 : i32
    %c0_i32_1 = arith.constant 0 : i32
    return %c0_i32, %c0_i32_0 : i32, i32
  }
  func.func @transform_14(%arg0: i32) -> (i32, i32) {
    %c0_i32 = arith.constant 0 : i32
    %c0_i32_0 = arith.constant 0 : i32
    return %c0_i32, %arg0 : i32, i32
  }
  func.func @transform_15(%arg0: i32) -> (i32, i32) {
    %c0_i32 = arith.constant 0 : i32
    %c0_i32_0 = arith.constant 0 : i32
    return %c0_i32, %arg0 : i32, i32
  }
}

</mosaic_0001>

<bundles_post_ra>
// kernel: tpu_custom_call.1
= control target key start
LH: loop header
LB: loop body
LE: loop exit
PB: predicated region body
PF: predicated region fallthrough
CT: control target
= control target key end

     0   :  { %21 = vsyncpa [#allocation3], 0  ;;  %vm89_vm0 = vcmask 130048   ;;  %v892_v4 = vmov 0   ;;  %s1133_s0 = inlined_call_operand.vmem [shape: f32[16,128], index: 0, kind: input, shape index: {}]   ;;  %s1134_s1 = inlined_call_operand.vmem [shape: f32[4,128], index: 1, kind: input, shape index: {}]   ;;  %s1135_s2 = inlined_call_operand.vmem [shape: f32[32,16], index: 2, kind: input, shape index: {}]   ;;  %s1136_s3 = inlined_call_operand.vmem [shape: f32[32,1], index: 3, kind: input, shape index: {}]   ;;  %s1137_s4 = inlined_call_operand.vmem [shape: f32[32,1], index: 4, kind: input, shape index: {}]   ;;  %s1138_s5 = inlined_call_operand.vmem [shape: f32[32,1], index: 5, kind: input, shape index: {}]   ;;  %s1139_s6 = inlined_call_operand.vmem [shape: f32[32,32], index: 6, kind: input, shape index: {}]   ;;  %s1140_s7 = inlined_call_operand.vmem [shape: f32[32,1], index: 7, kind: input, shape index: {}]   ;;  %s1141_s8 = inlined_call_operand.vmem [shape: f32[32,1], index: 8, kind: input, shape index: {}]   ;;  %s1142_s9 = inlined_call_operand.vmem [shape: f32[32,1], index: 9, kind: input, shape index: {}]   ;;  %s1143_s10 = inlined_call_operand.vmem [shape: f32[4,32], index: 10, kind: input, shape index: {}]   ;;  %s1144_s11 = inlined_call_operand.vmem [shape: f32[4,1], index: 11, kind: input, shape index: {}]   ;;  %s1145_s12 = inlined_call_operand.vmem [shape: f32[4,32], index: 12, kind: input, shape index: {}]   ;;  %s1146_s13 = inlined_call_operand.vmem [shape: f32[4,1], index: 13, kind: input, shape index: {}]   ;;  %s1147_s14 = inlined_call_operand.hbm [shape: f32[4,128], index: 14, kind: output, shape index: {0}]   ;;  %s1148_s15 = inlined_call_operand.hbm [shape: f32[1,128], index: 15, kind: output, shape index: {1}]  }
   0x1   :  { %v51_v0 = vld [vmem:[%s1133_s0] sm:$0xff]  ;;  %v52_v1 = vld [vmem:[%s1133_s0 + $0x8] sm:$0xff]  ;;  %830 = vset.pattern.permute.xlu0 %v892_v4  ;;  %831 = vset.pattern.permute.xlu1 %v892_v4  ;;  %v59_v6 = vld [vmem:[%s1136_s3 + $0x10] sm:$0xff] }
   0x2   :  { %v53_v2 = vld [vmem:[%s1135_s2] sm:$0xff]  ;;  %v800_v3 = vpack.c.bf16 %v52_v1, %v51_v0  ;;  %v54_v7 = vld [vmem:[%s1135_s2 + $0x8] sm:$0xff]  ;;  %81 = vperm.xlu1 %831, %v59_v6   ;;  %v55_v9 = vld [vmem:[%s1135_s2 + $0x10] sm:$0xff] }
   0x3   :  { %758 = vmatprep.mubr.msk.f32.mxu0 %vm89_vm0, %v53_v2  ;;  %v57_v5 = vld [vmem:[%s1136_s3] sm:$0xff]  ;;  %v58_v8 = vld [vmem:[%s1136_s3 + $0x8] sm:$0xff]  ;;  %v60_v10 = vld [vmem:[%s1136_s3 + $0x18] sm:$0xff] }
   0x4   :  { %801 = vmatprep.subr.bf16.mxu0 %v800_v3  ;;  %71 = vperm.xlu0 %830, %v57_v5   ;;  %v56_v11 = vld [vmem:[%s1135_s2 + $0x18] sm:$0xff]  ;;  %v61_v12 = vld [vmem:[%s1137_s4] sm:$0xff]  ;;  %v62_v13 = vld [vmem:[%s1137_s4 + $0x8] sm:$0xff] }
   0x5   :  { %803 = vmatpush3.bf16.msra.mxu0 %v800_v3 }
   0x6   :  { %86 = vperm.xlu1 %831, %v60_v10  }
   0x8   :  { %759 = vmatmul.mubr.msk.f32.vlgmr.msra.gmra.mrb[0].mxu0 %vm89_vm0, %v54_v7  ;;  %76 = vperm.xlu0 %830, %v58_v8  }
   0x9   :  { %761 = vmatprep.mubr.msk.f32.mxu0 %vm89_vm0, %v55_v9 }
   0xa   :  { %22 = vsyncpa [#allocation5], 0  ;;  %228 = vperm.xlu1 %831, %v62_v13   ;;  %v65_v14 = vld [vmem:[%s1138_s5] sm:$0xff]  ;;  %v66_v15 = vld [vmem:[%s1138_s5 + $0x8] sm:$0xff]  ;;  %vm309_vm1 = vcmask 261120   ;;  %vm894_vm2 = vmmov 0  }
   0xb   :  { %v63_v16 = vld [vmem:[%s1137_s4 + $0x10] sm:$0xff]  ;;  %v64_v17 = vld [vmem:[%s1137_s4 + $0x18] sm:$0xff]  ;;  %v277_v20 = vld [vmem:[%s1140_s7] sm:$0xff] }
   0xc   :  { %762 = vmatmul.mubr.msk.f32.gmra.mrb[2].mxu0 %vm89_vm0, %v56_v11  ;;  %223 = vperm.xlu0 %830, %v61_v12   ;;  %v67_v18 = vld [vmem:[%s1138_s5 + $0x10] sm:$0xff]  ;;  %v68_v19 = vld [vmem:[%s1138_s5 + $0x18] sm:$0xff]  ;;  %v278_v21 = vld [vmem:[%s1140_s7 + $0x8] sm:$0xff] }
   0xd   :  { %v279_v22 = vld [vmem:[%s1140_s7 + $0x10] sm:$0xff]  ;;  %v280_v23 = vld [vmem:[%s1140_s7 + $0x18] sm:$0xff]  ;;  %v281_v24 = vld [vmem:[%s1141_s8] sm:$0xff] }
   0xe   :  { %252 = vperm.xlu1 %831, %v66_v15   ;;  %v282_v25 = vld [vmem:[%s1141_s8 + $0x8] sm:$0xff]  ;;  %v285_v26 = vld [vmem:[%s1142_s9] sm:$0xff]  ;;  %v283_v28 = vld [vmem:[%s1141_s8 + $0x10] sm:$0xff] }
   0xf   :  { %v286_v27 = vld [vmem:[%s1142_s9 + $0x8] sm:$0xff]  ;;  %v284_v29 = vld [vmem:[%s1141_s8 + $0x18] sm:$0xff]  ;;  %v287_v30 = vld [vmem:[%s1142_s9 + $0x10] sm:$0xff] }
  0x10   :  { %247 = vperm.xlu0 %830, %v65_v14   ;;  %v288_v31 = vld [vmem:[%s1142_s9 + $0x18] sm:$0xff]  ;;  %v492_v32 = vld [vmem:[%s1146_s13] sm:$0xf] }
  0x11   :  { %v490_v33 = vld [vmem:[%s1144_s11] sm:$0xf] }
  0x12   :  { %238 = vperm.xlu1 %831, %v64_v17   ;;  %v273_v34 = vld [vmem:[%s1139_s6] sm:$0xff] }
  0x13   :  { %772 = vmatprep.mubr.msk.f32.mxu1 %vm309_vm1, %v273_v34 }
  0x14   :  { %233 = vperm.xlu0 %830, %v63_v16  }
  0x16   :  { %262 = vperm.xlu1 %831, %v68_v19  }
  0x18   :  { %257 = vperm.xlu0 %830, %v67_v18  }
  0x1a   :  { %296 = vperm.xlu1 %831, %v278_v21  }
  0x1c   :  { %291 = vperm.xlu0 %830, %v277_v20  }
  0x1e   :  { %306 = vperm.xlu1 %831, %v280_v23  }
  0x20   :  { %301 = vperm.xlu0 %830, %v279_v22  }
  0x22   :  { %448 = vperm.xlu1 %831, %v282_v25  }
  0x24   :  { %443 = vperm.xlu0 %830, %v281_v24  }
  0x26   :  { %472 = vperm.xlu1 %831, %v286_v27  }
  0x28   :  { %467 = vperm.xlu0 %830, %v285_v26  }
  0x2a   :  { %458 = vperm.xlu1 %831, %v284_v29  }
  0x2c   :  { %453 = vperm.xlu0 %830, %v283_v28  }
  0x2e   :  { %482 = vperm.xlu1 %831, %v288_v31  }
  0x30   :  { %477 = vperm.xlu0 %830, %v287_v30  }
  0x32   :  { %495 = vperm.xlu1 %831, %v490_v33  }
  0x34   :  { %573 = vperm.xlu0 %830, %v492_v32  }
  0x81   :  { %v82_v38 = vpop.permute.xlu1 %81 }
  0x83   :  { %v72_v35 = vpop.permute.xlu0 %71 }
  0x85   :  { %v87_v46 = vpop.permute.xlu1 %86 }
  0x87   :  { %v77_v36 = vpop.permute.xlu0 %76 }
  0x89   :  { %v229_v11 = vpop.permute.xlu1 %228 }
  0x8b   :  { %v224_v10 = vpop.permute.xlu0 %223 }
  0x8d   :  { %v253_v15 = vpop.permute.xlu1 %252 }
  0x8f   :  { %v248_v14 = vpop.permute.xlu0 %247 }
  0x91   :  { %v239_v17 = vpop.permute.xlu1 %238 }
  0x93   :  { %v234_v16 = vpop.permute.xlu0 %233 }
  0x95   :  { %v263_v28 = vpop.permute.xlu1 %262 }
  0x97   :  { %v258_v27 = vpop.permute.xlu0 %257 }
  0xdb   :  { %v760_v37 = vpop.f32.mrb[0].mxu0 }
  0xdc   :  { %v174_v39 = vadd.f32 %v760_v37, %v77_v36  ;;  %v168_v40 = vpop.f32.mrb[1].mxu0 }
  0xdd   :  { %v169_v41 = vadd.f32 %v168_v40, %v72_v35  ;;  %v275_v40 = vld [vmem:[%s1139_s6 + $0x10] sm:$0xff] }
  0xdf   :  { %v187_v42 = vadd.f32 %v174_v39, %v169_v41  ;;  %v763_v43 = vpop.f32.mrb[2].mxu0 }
  0xe0   :  { %v178_v44 = vpop.f32.mrb[3].mxu0  ;;  %v184_v47 = vadd.f32 %v763_v43, %v87_v46  ;;  %v895_v43 = vmov 0.0  }
  0xe1   :  { %v179_v45 = vadd.f32 %v178_v44, %v82_v38  ;;  %786 = vmatprep.mubr.msk.f32.mxu0 %vm894_vm2, %v895_v43  ;;  %v292_v44 = vpop.permute.xlu0 %291 }
  0xe3   :  { %v188_v48 = vadd.f32 %v187_v42, %v179_v45  ;;  %v893_v42 = vmov 0.0|0.0  }
  0xe4   :  { %812 = vmatprep.subr.bf16.mxu0 %v893_v42 }
  0xe5   :  { %v189_v49 = vadd.f32 %v188_v48, %v184_v47 }
  0xe7   :  { %v190_v50 = vrot.slane %v189_v49, 4 }
  0xe9   :  { %v191_v51 = vadd.f32 %v190_v50, %v189_v49 }
  0xeb   :  { %v192_v52 = vrot.slane %v191_v51, 2 }
  0xed   :  { %v193_v53 = vadd.f32 %v192_v52, %v191_v51  ;;  %v302_v52 = vpop.permute.xlu0 %301 }
  0xef   :  { %v194_v54 = vrot.slane %v193_v53, 1 }
  0xf1   :  { %v195_v55 = vadd.f32 %v194_v54, %v193_v53 }
  0xf3   :  { %v196_v56 = vmul.f32 0.03125, %v195_v55 }
  0xf5   :  { %v197_v57 = vsub.f32 %v169_v41, %v196_v56  ;;  %v198_v58 = vsub.f32 %v174_v39, %v196_v56  ;;  %v199_v59 = vsub.f32 %v179_v45, %v196_v56  ;;  %v200_v60 = vsub.f32 %v184_v47, %v196_v56  ;;  %v274_v39 = vld [vmem:[%s1139_s6 + $0x8] sm:$0xff]  ;;  %v276_v41 = vld [vmem:[%s1139_s6 + $0x18] sm:$0xff]  ;;  %v297_v45 = vpop.permute.xlu1 %296 }
  0xf7   :  { %v201_v61 = vmul.f32 %v197_v57, %v197_v57  ;;  %v202_v62 = vmul.f32 %v198_v58, %v198_v58  ;;  %v203_v63 = vmul.f32 %v199_v59, %v199_v59  ;;  %v204_v1 = vmul.f32 %v200_v60, %v200_v60 }
  0xf9   :  { %v205_v0 = vadd.f32 %v202_v62, %v201_v61  ;;  %v307_v55 = vpop.permute.xlu1 %306 }
  0xfb   :  { %v206_v2 = vadd.f32 %v205_v0, %v203_v63 }
  0xfd   :  { %v207_v3 = vadd.f32 %v206_v2, %v204_v1 }
  0xff   :  { %v208_v4 = vrot.slane %v207_v3, 4 }
 0x101   :  { %v209_v5 = vadd.f32 %v208_v4, %v207_v3 }
 0x103   :  { %v210_v6 = vrot.slane %v209_v5, 2 }
 0x105   :  { %v211_v7 = vadd.f32 %v210_v6, %v209_v5 }
 0x107   :  { %v212_v8 = vrot.slane %v211_v7, 1 }
 0x109   :  { %v213_v9 = vadd.f32 %v212_v8, %v211_v7 }
 0x10b   :  { %v214_v12 = vmul.f32 0.03125, %v213_v9 }
 0x10d   :  { %v215_v13 = vadd.f32 1e-05, %v214_v12 }
 0x10f   :  { %832 = vrsqrt.f32 %v215_v13 }
 0x119   :  { %v833_v18 = vpop.eup %832 }
 0x11a   :  { %v219_v19 = vmul.f32 %v833_v18, %v199_v59  ;;  %v217_v20 = vmul.f32 %v833_v18, %v197_v57  ;;  %v218_v21 = vmul.f32 %v833_v18, %v198_v58  ;;  %v220_v22 = vmul.f32 %v833_v18, %v200_v60 }
 0x11c   :  { %v243_v23 = vmul.f32 %v234_v16, %v219_v19  ;;  %v241_v24 = vmul.f32 %v224_v10, %v217_v20  ;;  %v242_v25 = vmul.f32 %v229_v11, %v218_v21  ;;  %v244_v26 = vmul.f32 %v239_v17, %v220_v22  ;;  %v444_v19 = vpop.permute.xlu0 %443  ;;  %v449_v20 = vpop.permute.xlu1 %448 }
 0x11e   :  { %v265_v29 = vadd.f32 %v248_v14, %v241_v24  ;;  %v266_v30 = vadd.f32 %v253_v15, %v242_v25  ;;  %v267_v31 = vadd.f32 %v258_v27, %v243_v23  ;;  %v268_v32 = vadd.f32 %v263_v28, %v244_v26 }
 0x120   :  { %v269_v33 = vmax.f32 %v265_v29, 0.0  ;;  %v270_v34 = vmax.f32 %v266_v30, 0.0  ;;  %v271_v35 = vmax.f32 %v267_v31, 0.0  ;;  %v272_v36 = vmax.f32 %v268_v32, 0.0  ;;  %v468_v23 = vpop.permute.xlu0 %467  ;;  %v473_v24 = vpop.permute.xlu1 %472 }
 0x122   :  { %v804_v37 = vpack.c.bf16 %v270_v34, %v269_v33  ;;  %v808_v38 = vpack.c.bf16 %v272_v36, %v271_v35 }
 0x124   :  { %805 = vmatprep.subr.bf16.mxu1 %v804_v37  ;;  %v454_v25 = vpop.permute.xlu0 %453  ;;  %v459_v26 = vpop.permute.xlu1 %458 }
 0x125   :  { %807 = vmatpush3.bf16.msra.mxu1 %v804_v37 }
 0x126   :  { %809 = vmatprep.subr.bf16.mxu1 %v808_v38 }
 0x128   :  { %v478_v36 = vpop.permute.xlu0 %477  ;;  %v483_v37 = vpop.permute.xlu1 %482 }
 0x129   :  { %811 = vmatpush3.bf16.msra.mxu1 %v808_v38 }
 0x12a   :  { %818 = vmatprep.subr.bf16.mxu1 %v893_v42 }
 0x12c   :  { %773 = vmatmul.mubr.msk.f32.vlgmr.msra.gmra.mrb[0].mxu1 %vm309_vm1, %v274_v39 }
 0x12d   :  { %775 = vmatprep.mubr.msk.f32.mxu1 %vm309_vm1, %v275_v40 }
 0x130   :  { %776 = vmatmul.mubr.msk.f32.gmra.mrb[2].mxu1 %vm309_vm1, %v276_v41 }
 0x131   :  { %797 = vmatprep.mubr.msk.f32.mxu1 %vm894_vm2, %v895_v43 }
 0x1ff   :  { %v774_v46 = vpop.f32.mrb[0].mxu1 }
 0x200   :  { %v394_v47 = vadd.f32 %v774_v46, %v297_v45  ;;  %v388_v48 = vpop.f32.mrb[1].mxu1  ;;  %v489_v45 = vld [vmem:[%s1143_s10] sm:$0xf] }
 0x201   :  { %v389_v49 = vadd.f32 %v388_v48, %v292_v44  ;;  %v491_v46 = vld [vmem:[%s1145_s12] sm:$0xf]  ;;  %s896_s12 = smov [#allocation2]  }
 0x202   :  { %s697_s30 = sshll.u32 %s896_s12, 4  ;;  %s698_s30 = int_to_ptr.vmem [resolvable:$true] %s697_s30 }
 0x203   :  { %v407_v50 = vadd.f32 %v394_v47, %v389_v49  ;;  %v777_v51 = vpop.f32.mrb[2].mxu1  ;;  %s844_s7 = scalar_lea.vmem %s698_s30, 64  ;;  %p849_p1 = scmp.lt.s32.totalorder %s698_s30, %s698_s30 }
 0x204   :  { %v398_v53 = vpop.f32.mrb[3].mxu1  ;;  %v404_v56 = vadd.f32 %v777_v51, %v307_v55  ;;  %p845_p0 = scmp.ne.s32.totalorder %s698_s30, %s844_s7  ;;  %p850_p2 = scmp.lt.s32.totalorder %s844_s7, %s844_s7 }
 0x205   :  { %v399_v54 = vadd.f32 %v398_v53, %v302_v52 }
 0x206   :  { %p851_p3 = por %p850_p2, %p849_p1 }
 0x207   :  { %v408_v57 = vadd.f32 %v407_v50, %v399_v54 }
 0x208   :  { %p852_p4 = pnand %p851_p3, %p845_p0 }
 0x209   :  { %v409_v58 = vadd.f32 %v408_v57, %v404_v56  ;;  %v653_v57 = vld [vmem:[%s1134_s1] sm:$0xf] }
 0x20b   :  { %v410_v59 = vrot.slane %v409_v58, 4 }
 0x20d   :  { %v411_v60 = vadd.f32 %v410_v59, %v409_v58 }
 0x20f   :  { %v412_v61 = vrot.slane %v411_v60, 2 }
 0x211   :  { %v413_v62 = vadd.f32 %v412_v61, %v411_v60 }
 0x213   :  { %v414_v63 = vrot.slane %v413_v62, 1 }
 0x215   :  { %v415_v0 = vadd.f32 %v414_v63, %v413_v62 }
 0x217   :  { %v416_v1 = vmul.f32 0.03125, %v415_v0 }
 0x219   :  { %v417_v2 = vsub.f32 %v389_v49, %v416_v1  ;;  %v418_v3 = vsub.f32 %v394_v47, %v416_v1  ;;  %v419_v4 = vsub.f32 %v399_v54, %v416_v1  ;;  %v420_v5 = vsub.f32 %v404_v56, %v416_v1  ;;  %v574_v47 = vpop.permute.xlu0 %573  ;;  %v496_v56 = vpop.permute.xlu1 %495 }
 0x21b   :  { %v421_v6 = vmul.f32 %v417_v2, %v417_v2  ;;  %v422_v7 = vmul.f32 %v418_v3, %v418_v3  ;;  %v423_v8 = vmul.f32 %v419_v4, %v419_v4  ;;  %v424_v10 = vmul.f32 %v420_v5, %v420_v5 }
 0x21d   :  { %v425_v9 = vadd.f32 %v422_v7, %v421_v6 }
 0x21f   :  { %v426_v11 = vadd.f32 %v425_v9, %v423_v8 }
 0x221   :  { %v427_v12 = vadd.f32 %v426_v11, %v424_v10 }
 0x223   :  { %v428_v13 = vrot.slane %v427_v12, 4 }
 0x225   :  { %v429_v14 = vadd.f32 %v428_v13, %v427_v12 }
 0x227   :  { %v430_v15 = vrot.slane %v429_v14, 2 }
 0x229   :  { %v431_v16 = vadd.f32 %v430_v15, %v429_v14 }
 0x22b   :  { %v432_v17 = vrot.slane %v431_v16, 1 }
 0x22d   :  { %v433_v18 = vadd.f32 %v432_v17, %v431_v16 }
 0x22f   :  { %v434_v21 = vmul.f32 0.03125, %v433_v18 }
 0x231   :  { %v435_v22 = vadd.f32 1e-05, %v434_v21 }
 0x233   :  { %834 = vrsqrt.f32 %v435_v22 }
 0x23d   :  { %v835_v27 = vpop.eup %834 }
 0x23e   :  { %v439_v28 = vmul.f32 %v835_v27, %v419_v4  ;;  %v437_v29 = vmul.f32 %v835_v27, %v417_v2  ;;  %v438_v30 = vmul.f32 %v835_v27, %v418_v3  ;;  %v440_v31 = vmul.f32 %v835_v27, %v420_v5 }
 0x240   :  { %v463_v32 = vmul.f32 %v454_v25, %v439_v28  ;;  %v461_v33 = vmul.f32 %v444_v19, %v437_v29  ;;  %v462_v34 = vmul.f32 %v449_v20, %v438_v30  ;;  %v464_v35 = vmul.f32 %v459_v26, %v440_v31 }
 0x242   :  { %v487_v38 = vadd.f32 %v478_v36, %v463_v32  ;;  %v485_v39 = vadd.f32 %v468_v23, %v461_v33  ;;  %v486_v40 = vadd.f32 %v473_v24, %v462_v34  ;;  %v488_v41 = vadd.f32 %v483_v37, %v464_v35 }
 0x244   :  { %v813_v43 = vpack.c.bf16 %v486_v40, %v485_v39  ;;  %v816_v44 = vpack.c.bf16 %v488_v41, %v487_v38 }
 0x246   :  { %814 = vmatpush3.bf16.msra.mxu0 %v813_v43  ;;  %820 = vmatpush3.bf16.msra.mxu1 %v813_v43 }
 0x247   :  { %815 = vmatprep.subr.bf16.mxu0 %v893_v42  ;;  %821 = vmatprep.subr.bf16.mxu1 %v893_v42 }
 0x24a   :  { %817 = vmatpush3.bf16.msra.mxu0 %v816_v44  ;;  %823 = vmatpush3.bf16.msra.mxu1 %v816_v44 }
 0x24d   :  { %787 = vmatmul.mubr.msk.f32.vlgmr.msra.gmra.mrb[4].mxu0 %vm309_vm1, %v489_v45  ;;  %798 = vmatmul.mubr.msk.f32.vlgmr.msra.gmra.mrb[4].mxu1 %vm309_vm1, %v491_v46 }
 0x320   :  { %v567_v48 = vpop.f32.mrb[4].mxu0  ;;  %v645_v49 = vpop.f32.mrb[4].mxu1 }
 0x321   :  { %v646_v50 = vadd.f32 %v645_v49, %v574_v47  ;;  %v799_v51 = vpop.f32.mrb[5].mxu1  ;;  %v788_v42 = vpop.f32.mrb[5].mxu0  ;;  %v568_v58 = vadd.f32 %v567_v48, %v496_v56 }
 0x323   :  { %v649_v52 = vmax.f32 %v646_v50, -20.0 }
 0x325   :  { %v650_v53 = vmin.f32 %v649_v52, 2.0 }
 0x327   :  { %v651_v54 = vmul.f32 1.442695, %v650_v53 }
 0x329   :  { %836 = vpow2.f32 %v651_v54 }
 0x333   :  { %v837_v55 = vpop.eup %836 }
 0x334   :  { %v654_v59 = vmul.f32 %v837_v55, %v653_v57 }
 0x336   :  { %v655_v60 = vadd.f32 %v654_v59, %v568_v58 }
 0x338   :  { %v661_v61 = vmul.f32 -2.0, %v655_v60  ;;  %838 = vtanh.f32 %v655_v60 }
 0x33a   :  { %v663_v62 = vand.u32 2147483647, %v661_v61 }
 0x33c   :  { %v664_v63 = vsub.f32 0.0, %v663_v62 }
 0x33e   :  { %v665_v0 = vmul.f32 1.442695, %v664_v63 }
 0x340   :  { %840 = vpow2.f32 %v665_v0 }
 0x342   :  { %v839_v1 = vpop.eup %838 }
 0x343   :  { %690 = vst [vmem:[#allocation2] sm:$0xf] %v839_v1 }
 0x344   :  { %855 = shalt.err (!%p852_p4)
}
 0x345   :  { %s856_s17 = scalar_lea.hbm %s1147_s14, 64 }
 0x346   :  { %p857_p5 = scmp.ne.s32.totalorder %s1147_s14, %s856_s17  ;;  %p860_p6 = scmp.lt.u32.totalorder %s856_s17, %s1147_s14 }
 0x348   :  { %p862_p7 = pnand %p860_p6, %p857_p5 }
 0x34a   :  { %865 = shalt.err (!%p862_p7)
}
 0x34b   :  { %700 = dma.vmem_to_hbm [thread:$0]  %s698_s30, 64, %s1147_s14, [#allocation3]   ;;  %v841_v2 = vpop.eup %840  ;;  %v656_v5 = vmul.f32 -0.5, %v653_v57  ;;  %v662_v12 = vmax.f32 %v661_v61, 0.0  ;;  %v660_v15 = vsub.f32 0.6931472, %v655_v60 }
 0x34c   :  { %v667_v3 = vadd.f32 1.0, %v841_v2  ;;  %v670_v4 = vmul.f32 -0.5, %v841_v2  ;;  %v673_v7 = vand.u32 2147483647, %v841_v2  ;;  %vm680_vm4 = vcmask 1043456   ;;  %s897_s14 = smov [#allocation4]  }
 0x34d   :  { %v657_v9 = vmul.f32 %v656_v5, %v653_v57  ;;  %s707_s4 = sshll.u32 %s897_s14, 4  ;;  %s708_s4 = int_to_ptr.vmem [resolvable:$true] %s707_s4 }
 0x34e   :  { %842 = vlog2.f32 %v667_v3  ;;  %v671_v6 = vadd.f32 1.0, %v670_v4  ;;  %vm674_vm3 = vcmp.lt.f32.partialorder %v673_v7, 0.0004427343  ;;  %s866_s24 = scalar_lea.vmem %s708_s4, 16  ;;  %s870_s25 = scalar_lea.vmem %s708_s4, 32 }
 0x34f   :  { %v658_v14 = vsub.f32 %v657_v9, %v650_v53  ;;  %p867_p8 = scmp.ne.s32.totalorder %s708_s4, %s866_s24  ;;  %p871_p9 = scmp.lt.s32.totalorder %s708_s4, %s708_s4 }
 0x350   :  { %v672_v11 = vmul.f32 %v841_v2, %v671_v6  ;;  %p872_p10 = scmp.lt.s32.totalorder %s870_s25, %s866_s24 }
 0x351   :  { %v729_v18 = vadd.f32 -0.9189385, %v658_v14 }
 0x352   :  { %p873_p11 = por %p872_p10, %p871_p9 }
 0x354   :  { %p874_p12 = pnand %p873_p11, %p867_p8 }
 0x358   :  { %v843_v8 = vpop.eup %842 }
 0x359   :  { %v669_v10 = vmul.f32 0.6931472, %v843_v8 }
 0x35b   :  { %v675_v13 = vsel %vm674_vm3, %v672_v11, %v669_v10 }
 0x35c   :  { %v676_v16 = vadd.f32 %v675_v13, %v662_v12 }
 0x35e   :  { %v677_v17 = vsub.f32 %v660_v15, %v676_v16 }
 0x360   :  { %v678_v19 = vmul.f32 2.0, %v677_v17 }
 0x362   :  { %v679_v20 = vsub.f32 %v729_v18, %v678_v19 }
 0x364   :  { %v681_v21 = vsel %vm680_vm4, %v679_v20, 0.0 }
 0x365   :  { %v682_v22 = vrot.slane %v681_v21, 4 }
 0x367   :  { %v683_v23 = vadd.f32 %v682_v22, %v681_v21 }
 0x369   :  { %v684_v24 = vrot.slane %v683_v23, 2 }
 0x36b   :  { %v685_v25 = vadd.f32 %v684_v24, %v683_v23 }
 0x36d   :  { %v686_v26 = vrot.slane %v685_v25, 1 }
 0x36f   :  { %v687_v27 = vadd.f32 %v686_v26, %v685_v25 }
 0x371   :  { %688 = vst [vmem:[#allocation4] sm:$0x1] %v687_v27 }
 0x372   :  { %877 = shalt.err (!%p874_p12)
}
 0x373   :  { %s878_s9 = scalar_lea.hbm %s1148_s15, 16 }
 0x374   :  { %p879_p13 = scmp.ne.s32.totalorder %s1148_s15, %s878_s9  ;;  %p882_p0 = scmp.lt.u32.totalorder %s878_s9, %s1148_s15 }
 0x376   :  { %p884_p1 = pnand %p882_p0, %p879_p13 }
 0x378   :  { %887 = shalt.err (!%p884_p1)
}
 0x379   :  { %710 = dma.vmem_to_hbm [thread:$0]  %s708_s4, 16, %s1148_s15, [#allocation5]  }
 0x37a   :  { %888 = dma.done.wait [#allocation3], 64  }
 0x37b   :  { %889 = vsyncadd [#allocation3], 4294967232 }
 0x37c   :  { %890 = dma.done.wait [#allocation5], 16  }
 0x37d   :  { %891 = vsyncadd [#allocation5], 4294967280 }
 0x37e   :  { %717 = vsyncpa [#allocation3], 1 }
 0x37f   :  { %718 = vsyncpa [#allocation5], 1 }

</bundles_post_ra>
